<compile_context>
chip_gen: v7x
topology: tpu7x:2x2x1
jax: 0.10.0
libtpu: 0.0.40
codegen_flags: <defaults>
</compile_context>

<pallas_src>
import functools

import jax
import jax.numpy as jnp
import numpy as np
from jax import lax
from jax.experimental import pallas as pl
from jax.experimental.pallas import tpu as pltpu

KERNEL_SIZE = 3
CHANNELS = [1, 8, 16, 32, 1]   # [1] + channel + [1] from the module __init__

_LANE = 128
_VMEM_BUDGET_BYTES = 40 * 1024 * 1024   # keep peak tile footprint under ~40 MiB
_BYTES_PER_FLAT_COL = 768                # ~live f32 rows per flat column + slack
_SCRATCH_ROWS = 3 * max(CHANNELS[1:-2])  # im2col scratch for layers 1-2 (= 48)


@functools.cache
def _pltpu_roll_is_numpy_roll() -> bool:
    """One-time probe: does pltpu.roll rotate in the same direction as np.roll?"""
    def probe(x_ref, o_ref):
        o_ref[...] = pltpu.roll(x_ref[...], 128, axis=1)

    x = jnp.arange(8 * 256, dtype=jnp.float32).reshape(8, 256)
    y = pl.pallas_call(
        probe, out_shape=jax.ShapeDtypeStruct((8, 256), jnp.float32))(x)
    return bool(jnp.array_equal(y, jnp.roll(x, 128, axis=1)))


def _roll_lanes(a, shift):
    """Static circular shift along the flat (lane) axis via the XLU."""
    if shift == 0:
        return a
    return pltpu.roll(a, shift, axis=1)


def simpleconv_kernel(x_ref,
                      w0_ref, b0_ref, w1_ref, b1_ref,
                      w2_ref, b2_ref, w3_ref, b3_ref,
                      o_ref, s_ref, *, s_prev, s_next):
    """One batch tile. Activations are (C, n): l-major, batch on the lanes."""
    x0 = x_ref[0]                                    # (1, n)

    # ---- layer 0: C_in=1 -> 8.  Contraction is only 3 -> stay on the VPU. ----
    w0 = w0_ref[...]                                 # (8, 3)
    h = (b0_ref[...]
         + w0[:, 0:1] * _roll_lanes(x0, s_prev)      # tap k=0 sees x[l-1]
         + w0[:, 1:2] * x0                           # tap k=1 sees x[l]
         + w0[:, 2:3] * _roll_lanes(x0, s_next))     # tap k=2 sees x[l+1]
    h = jnp.maximum(h, 0.0)

    # ---- layers 1-2: rolled taps written into ONE persistent scratch, then ----
    # ---- a single K-stacked MXU matmul per layer (K = 3*C_in).             ----
    for w_ref, b_ref in ((w1_ref, b1_ref), (w2_ref, b2_ref)):
        c_in = h.shape[0]
        s_ref[0:c_in, :] = _roll_lanes(h, s_prev)            # tap 0 rows
        s_ref[c_in:2 * c_in, :] = h                           # tap 1 rows
        s_ref[2 * c_in:3 * c_in, :] = _roll_lanes(h, s_next)  # tap 2 rows
        h = jnp.dot(w_ref[...], s_ref[0:3 * c_in, :],
                    preferred_element_type=jnp.float32,
                    precision=lax.Precision.HIGHEST) + b_ref[...]
        h = jnp.maximum(h, 0.0)

    # ---- layer 3: C_out=1 < C_in=32 -> roll-commutation on the OUTPUT side ----
    # y[k, :] = sum_c w3[0, c, k] * h[c, :];  out[l] = y[0,l-1] + y[1,l] + y[2,l+1]
    y = jnp.dot(w3_ref[...], h,                      # (3, n)
                preferred_element_type=jnp.float32,
                precision=lax.Precision.HIGHEST)
    o_ref[0] = (_roll_lanes(y[0:1, :], s_prev)
                + y[1:2, :]
                + _roll_lanes(y[2:3, :], s_next)
                + b3_ref[...])


def _pick_b_tile(L, B, requested):
    """Batch tile: multiple of 128 dividing the padded batch, VMEM-budgeted."""
    m = max(1, -(-B // _LANE))                       # padded batch, in lane units
    budget_units = max(1, _VMEM_BUDGET_BYTES // (L * _LANE * _BYTES_PER_FLAT_COL))
    req_units = requested // _LANE if requested >= _LANE else 1
    limit = max(1, min(req_units, m, budget_units))
    divisors = [u for u in range(1, m + 1) if m % u == 0]
    d = max(u for u in divisors if u <= limit)
    # Prefer >= 2 grid steps (v7x megacore split + DMA/compute pipelining).
    if m // d < 2 and m >= 2:
        proper = [u for u in divisors if u <= limit and u < m]
        if proper:
            d = max(proper)
    return _LANE * d


@functools.partial(jax.jit, static_argnames=("b_tile", "roll_np"))
def _forward_impl(x, params, *, b_tile, roll_np):
    L, B = x.shape
    nb = -(-B // b_tile)
    B_pad = nb * b_tile
    n = L * b_tile

    # Weight prep (tiny, XLA-side): tap-major im2col layout matching the
    # [prev; h; next] row order of the scratch.
    (w0, b0), (w1, b1), (w2, b2), (w3, b3) = params
    w0f = w0[:, 0, :].astype(jnp.float32)                                   # (8, 3)
    w1f = jnp.transpose(w1, (0, 2, 1)).reshape(w1.shape[0], -1).astype(jnp.float32)
    w2f = jnp.transpose(w2, (0, 2, 1)).reshape(w2.shape[0], -1).astype(jnp.float32)
    w3f = jnp.transpose(w3[0]).astype(jnp.float32)                          # (3, 32)
    flat = [w0f, b0.astype(jnp.float32), w1f, b1.astype(jnp.float32),
            w2f, b2.astype(jnp.float32), w3f, b3.astype(jnp.float32)]

    # (L, B) -> zero-pad batch to B_pad -> (nb, 1, L*b_tile): lane-dense flat
    # layout, l-major / batch-minor, so +-1 in L == +-b_tile flat columns.
    xp = x.astype(jnp.float32)
    if B_pad != B:
        xp = jnp.pad(xp, ((0, 0), (0, B_pad - B)))
    xr = (xp.reshape(L, nb, b_tile)
            .transpose(1, 0, 2)
            .reshape(nb, 1, n))

    s_prev = b_tile % n                 # rolled[i] = a[i - b_tile]  (value at l-1)
    s_next = (n - b_tile) % n           # rolled[i] = a[i + b_tile]  (value at l+1)
    if not roll_np:                     # pltpu.roll rotates the other way
        s_prev, s_next = s_next, s_prev

    def _const_spec(shape):
        zeros = (0,) * len(shape)
        return pl.BlockSpec(shape, lambda i, _z=zeros: _z)

    in_specs = [pl.BlockSpec((1, 1, n), lambda i: (i, 0, 0))]
    in_specs += [_const_spec(p.shape) for p in flat]

    out = pl.pallas_call(
        functools.partial(simpleconv_kernel, s_prev=s_prev, s_next=s_next),
        grid=(nb,),
        in_specs=in_specs,
        out_specs=pl.BlockSpec((1, 1, n), lambda i: (i, 0, 0)),
        out_shape=jax.ShapeDtypeStruct((nb, 1, n), jnp.float32),
        scratch_shapes=[pltpu.VMEM((_SCRATCH_ROWS, n), jnp.float32)],
        compiler_params=pltpu.CompilerParams(
            dimension_semantics=("parallel",),      # shard batch tiles over TCs
            vmem_limit_bytes=48 * 1024 * 1024),
    )(xr, *flat)

    # flat tiles -> (L, B_pad) -> drop the batch padding
    y = out.reshape(nb, L, b_tile).transpose(1, 0, 2).reshape(L, B_pad)
    return y[:, :B]


def simple_conv_forward(x, params, *, b_tile=512):
    """x: (L, B) float32; params: list of (w (Cout,Cin,3), b (Cout,1)) per layer."""
    L, B = x.shape
    bt = _pick_b_tile(L, B, b_tile)
    return _forward_impl(x, params, b_tile=bt,
                         roll_np=_pltpu_roll_is_numpy_roll())


def init_params(key):
    """Deterministic init mimicking nn.Conv1d default uniform(-1/sqrt(fan_in), .)."""
    params = []
    for i in range(len(CHANNELS) - 1):
        c_in, c_out = CHANNELS[i], CHANNELS[i + 1]
        key, kw, kb = jax.random.split(key, 3)
        bound = 1.0 / np.sqrt(c_in * KERNEL_SIZE)
        w = jax.random.uniform(kw, (c_out, c_in, KERNEL_SIZE),
                               jnp.float32, -bound, bound)
        b = jax.random.uniform(kb, (c_out, 1), jnp.float32, -bound, bound)
        params.append((w, b))
    return params


def reference_forward(x, params):
    """Pure-JAX reference of the same math (for correctness check)."""
    L, B = x.shape
    h = jnp.transpose(x).reshape(B, 1, L)          # (B, 1, L)
    n_layers = len(params)
    for li, (w, b) in enumerate(params):
        pad = KERNEL_SIZE // 2
        hp = jnp.concatenate([h[..., L - pad:], h, h[..., :pad]], axis=-1)
        out = jnp.zeros((B, w.shape[0], L), jnp.float32)
        for k in range(KERNEL_SIZE):
            out = out + jnp.einsum('bil,oi->bol', hp[..., k:k + L], w[:, :, k],
                                   precision=jax.lax.Precision.HIGHEST)
        h = out + b[None, :, :]
        if li < n_layers - 1:
            h = jnp.maximum(h, 0.0)
    return jnp.transpose(h.reshape(B, L))


if __name__ == "__main__":
    key = jax.random.PRNGKey(0)
    key, kx = jax.random.split(key)

    # Small (seq_len, batch). B=200 is not a multiple of 128, so this exercises
    # batch padding AND a 2-step grid (b_tile -> 128, nb -> 2).
    L, B = 16, 200
    x = jax.random.normal(kx, (L, B), jnp.float32)

    params = init_params(key)

    y = simple_conv_forward(x, params)
    y = jax.block_until_ready(y)

    y_ref = reference_forward(x, params)
    np.testing.assert_allclose(np.asarray(y), np.asarray(y_ref),
                               rtol=1e-5, atol=1e-5)
    assert y.shape == (L, B)

    print("KERNEL_OK")
</pallas_src>

<mosaic_0001>
module attributes {stable_mosaic.version = 11 : i64} {
  func.func @probe(%arg0: memref<8x256xf32, #tpu.memory_space<vmem>>, %arg1: memref<8x256xf32, #tpu.memory_space<vmem>>) attributes {dimension_semantics = [], scalar_prefetch = 0 : i64, scratch_operands = 0 : i64, tpu.core_type = #tpu.core_type<tc>} {
    %c0 = arith.constant 0 : index
    %c0_0 = arith.constant 0 : index
    %0 = vector.load %arg0[%c0, %c0_0] : memref<8x256xf32, #tpu.memory_space<vmem>>, vector<8x256xf32>
    %c128_i32 = arith.constant 128 : i32
    %1 = tpu.dynamic_rotate %0 by %c128_i32 dim 1 : vector<8x256xf32>, i32 -> vector<8x256xf32>
    %c0_1 = arith.constant 0 : index
    %c0_2 = arith.constant 0 : index
    %2 = vector.load %arg1[%c0_1, %c0_2] : memref<8x256xf32, #tpu.memory_space<vmem>>, vector<8x256xf32>
    tpu.vector_store %arg1[%c0_1, %c0_2], %1 {strides = array<i32>} : memref<8x256xf32, #tpu.memory_space<vmem>>, vector<8x256xf32>,
    return
  }
}

</mosaic_0001>

<bundles_post_ra>
// kernel: tpu_custom_call.1
= control target key start
LH: loop header
LB: loop body
LE: loop exit
PB: predicated region body
PF: predicated region fallthrough
CT: control target
= control target key end

     0   :  { %6 = vsyncpa [#allocation3], 0  ;;  %s126_s0 = inlined_call_operand.hbm [shape: f32[8,256], index: 0, kind: input, shape index: {}]   ;;  %s127_s1 = inlined_call_operand.hbm [shape: f32[8,256], index: 1, kind: output, shape index: {}]  }
   0x1   :  { %7 = vsyncpa [#allocation4], 0  ;;  %s90_s6 = smov [#allocation2]   ;;  %s42_s10 = scalar_lea.hbm %s126_s0, 256 }
   0x2   :  { %s14_s7 = sshll.u32 %s90_s6, 4  ;;  %p43_p0 = scmp.ne.s32.totalorder %s126_s0, %s42_s10  ;;  %s15_s7 = int_to_ptr.vmem [resolvable:$true] %s14_s7 }
   0x3   :  { %p46_p1 = scmp.lt.u32.totalorder %s42_s10, %s126_s0 }
   0x5   :  { %p48_p2 = pnand %p46_p1, %p43_p0 }
   0x7   :  { %51 = shalt.err (!%p48_p2)
}
   0x8   :  { %s52_s15 = scalar_lea.vmem %s15_s7, 256  ;;  %p57_p4 = scmp.lt.s32.totalorder %s15_s7, %s15_s7 }
   0x9   :  { %p53_p3 = scmp.ne.s32.totalorder %s15_s7, %s52_s15  ;;  %p58_p5 = scmp.lt.s32.totalorder %s52_s15, %s52_s15 }
   0xb   :  { %p59_p6 = por %p58_p5, %p57_p4 }
   0xd   :  { %p60_p7 = pnand %p59_p6, %p53_p3 }
   0xf   :  { %63 = shalt.err (!%p60_p7)
}
  0x10   :  { %17 = dma.hbm_to_vmem [thread:$0]  %s126_s0, 256, %s15_s7, [#allocation3]  }
  0x11   :  { %86 = dma.done.wait [#allocation3], 256  }
  0x12   :  { %87 = vsyncadd [#allocation3], 4294967040  ;;  %s91_s18 = smov [#allocation5]   ;;  %v22_v0 = vld [vmem:[#allocation2 + $0x8] sm:$0xff]  ;;  %v21_v1 = vld [vmem:[#allocation2] sm:$0xff] }
  0x13   :  { %s31_s19 = sshll.u32 %s91_s18, 4  ;;  %23 = vst [vmem:[#allocation5] sm:$0xff] %v22_v0  ;;  %24 = vst [vmem:[#allocation5 + $0x8] sm:$0xff] %v21_v1  ;;  %s32_s19 = int_to_ptr.vmem [resolvable:$true] %s31_s19 }
  0x14   :  { %s64_s20 = scalar_lea.vmem %s32_s19, 256  ;;  %p69_p9 = scmp.lt.s32.totalorder %s32_s19, %s32_s19 }
  0x15   :  { %p65_p8 = scmp.ne.s32.totalorder %s32_s19, %s64_s20  ;;  %p70_p10 = scmp.lt.s32.totalorder %s64_s20, %s64_s20 }
  0x17   :  { %p71_p11 = por %p70_p10, %p69_p9 }
  0x19   :  { %p72_p12 = pnand %p71_p11, %p65_p8 }
  0x1b   :  { %75 = shalt.err (!%p72_p12)
}
  0x1c   :  { %s76_s0 = scalar_lea.hbm %s127_s1, 256 }
  0x1d   :  { %p77_p13 = scmp.ne.s32.totalorder %s127_s1, %s76_s0  ;;  %p80_p0 = scmp.lt.u32.totalorder %s76_s0, %s127_s1 }
  0x1f   :  { %p82_p1 = pnand %p80_p0, %p77_p13 }
  0x21   :  { %85 = shalt.err (!%p82_p1)
}
  0x22   :  { %34 = dma.vmem_to_hbm [thread:$0]  %s32_s19, 256, %s127_s1, [#allocation4]  }
  0x23   :  { %88 = dma.done.wait [#allocation4], 256  }
  0x24   :  { %89 = vsyncadd [#allocation4], 4294967040 }
  0x25   :  { %38 = vsyncpa [#allocation3], 1 }
  0x26   :  { %39 = vsyncpa [#allocation4], 1 }

</bundles_post_ra>
